<compile_context>
chip_gen: v7x
topology: tpu7x:2x2x1
jax: 0.10.0
libtpu: 0.0.40
codegen_flags: <defaults>
</compile_context>

<pallas_src>
import functools
import math

import jax
import jax.numpy as jnp
from jax.experimental import pallas as pl
from jax.experimental.pallas import tpu as pltpu


# ---------------------------------------------------------------------------
# Stage 1: projection + attention coefficients (tiny, single block).
# ---------------------------------------------------------------------------
def _spgat_project_kernel(x_ref, w_ref, a_src_ref, a_dst_ref,
                          h_ref, f_src_ref, f_dst_ref):
    h = jnp.dot(x_ref[...], w_ref[...],
                preferred_element_type=jnp.float32)            # (N, Fout) f32
    h_ref[...] = h.astype(h_ref.dtype)                         # bf16 copy for attn@h
    # f_src[i] = a_src . h_i  -> (N, 1); f_dst[j] = a_dst . h_j -> (1, N)
    f_src_ref[...] = jax.lax.dot_general(
        h, a_src_ref[...], (((1,), (1,)), ((), ())),
        preferred_element_type=jnp.float32)
    f_dst_ref[...] = jax.lax.dot_general(
        a_dst_ref[...], h, (((1,), (1,)), ((), ())),
        preferred_element_type=jnp.float32)


# ---------------------------------------------------------------------------
# Stage 2: masked attention + aggregation, tiled over row blocks of size TM.
# ---------------------------------------------------------------------------
def _spgat_attend_kernel(f_src_ref, f_dst_ref, h_ref, adj_ref, o_ref, *,
                         alpha, concat):
    # Edge logits for this row tile: (TM,1) + (1,N) broadcast -> (TM,N).
    e = f_src_ref[...] + f_dst_ref[...]
    neg_lrelu = -jnp.where(e >= 0.0, e, alpha * e)             # -LeakyReLU(e)
    attn = jnp.where(adj_ref[...] != 0, jnp.exp(neg_lrelu), 0.0)   # f32 (TM, N)

    # TODO(synk): training-mode dropout on edge_e is omitted (eval-mode identity).

    rowsum = jnp.sum(attn, axis=-1, keepdims=True)             # (TM, 1) == e_rowsum
    ctx = jnp.dot(attn.astype(jnp.bfloat16), h_ref[...],
                  preferred_element_type=jnp.float32)          # (TM, Fout) bf16 MXU
    h_prime = ctx * pl.reciprocal(rowsum + 1e-8, approx=True)

    if concat:                                                 # F.elu
        h_prime = jnp.where(h_prime > 0.0, h_prime,
                            jnp.exp(jnp.minimum(h_prime, 0.0)) - 1.0)

    o_ref[...] = h_prime.astype(o_ref.dtype)


def _pick_block_rows(n, cap):
    for tm in (512, 256, 128, 64, 32):
        if tm <= cap and n % tm == 0:
            return tm
    return n


def sp_graph_attention_layer(x, adj, W, a, *, alpha, concat=True, block_rows=256):
    """Eval-mode forward of SpGraphAttentionLayer.

    x:   (N, Fin)  node features
    adj: (N, N)    adjacency (nonzero entries are edges)
    W:   (Fin, Fout)
    a:   (1, 2*Fout)
    """
    N, Fin = x.shape
    Fout = W.shape[1]
    a_src = a[:, :Fout].astype(jnp.float32)   # coefficient for the source/row node h_i
    a_dst = a[:, Fout:].astype(jnp.float32)   # coefficient for the dest/col node h_j

    # Adjacency only acts as a mask: ship the O(N^2) input as int8 (4x less DMA).
    if adj.dtype != jnp.int8:
        adj = (adj != 0).astype(jnp.int8)

    # ---- Stage 1: h, f_src, f_dst (single block, tiny) ----
    h_bf16, f_src, f_dst = pl.pallas_call(
        _spgat_project_kernel,
        out_shape=(
            jax.ShapeDtypeStruct((N, Fout), jnp.bfloat16),
            jax.ShapeDtypeStruct((N, 1), jnp.float32),
            jax.ShapeDtypeStruct((1, N), jnp.float32),
        ),
        grid=(1,),
        in_specs=[
            pl.BlockSpec((N, Fin), lambda i: (0, 0)),
            pl.BlockSpec((Fin, Fout), lambda i: (0, 0)),
            pl.BlockSpec((1, Fout), lambda i: (0, 0)),
            pl.BlockSpec((1, Fout), lambda i: (0, 0)),
        ],
        out_specs=(
            pl.BlockSpec((N, Fout), lambda i: (0, 0)),
            pl.BlockSpec((N, 1), lambda i: (0, 0)),
            pl.BlockSpec((1, N), lambda i: (0, 0)),
        ),
        compiler_params=pltpu.CompilerParams(
            dimension_semantics=("arbitrary",)),
    )(x.astype(jnp.float32), W.astype(jnp.float32), a_src, a_dst)

    # ---- Stage 2: row-tiled masked attention + aggregation ----
    tm = _pick_block_rows(N, block_rows)
    kernel = functools.partial(_spgat_attend_kernel,
                               alpha=float(alpha), concat=bool(concat))
    out = pl.pallas_call(
        kernel,
        out_shape=jax.ShapeDtypeStruct((N, Fout), jnp.float32),
        grid=(N // tm,),
        in_specs=[
            pl.BlockSpec((tm, 1), lambda i: (i, 0)),       # f_src: row tile
            pl.BlockSpec((1, N), lambda i: (0, 0)),        # f_dst: resident
            pl.BlockSpec((N, Fout), lambda i: (0, 0)),     # h (bf16): resident
            pl.BlockSpec((tm, N), lambda i: (i, 0)),       # adj (int8): streams
        ],
        out_specs=pl.BlockSpec((tm, Fout), lambda i: (i, 0)),
        compiler_params=pltpu.CompilerParams(
            dimension_semantics=("parallel",)),            # megacore-splittable on v7x
    )(f_src, f_dst, h_bf16, adj)
    return out


def _reference(x, adj, W, a, alpha, concat=True):
    """Pure-JAX dense equivalent of the PyTorch sparse formulation (eval mode)."""
    Fout = W.shape[1]
    h = x @ W
    f_src = h @ a[0, :Fout]
    f_dst = h @ a[0, Fout:]
    e = f_src[:, None] + f_dst[None, :]
    attn = jnp.where(adj != 0.0, jnp.exp(-jnp.where(e >= 0.0, e, alpha * e)), 0.0)
    rowsum = attn.sum(axis=-1, keepdims=True)
    h_prime = (attn @ h) / (rowsum + 1e-8)
    if concat:
        h_prime = jnp.where(h_prime > 0.0, h_prime,
                            jnp.exp(jnp.minimum(h_prime, 0.0)) - 1.0)
    return h_prime


if __name__ == "__main__":
    # Small, lane-friendly sizes: 256 nodes -> 4 row tiles of 64 (real pipelining),
    # Fin = 64, Fout = 128 (lane-dense output).
    N, F_IN, F_OUT = 256, 64, 128
    ALPHA = 0.2          # LeakyReLU negative slope
    # dropout = 0.6 in the PyTorch module; eval mode -> identity (see TODO in kernel)

    key = jax.random.PRNGKey(0)
    kx, kadj, kw, ka = jax.random.split(key, 4)

    x = jax.random.normal(kx, (N, F_IN), jnp.float32)
    adj = (jax.random.uniform(kadj, (N, N)) < 0.15).astype(jnp.float32)
    adj = jnp.maximum(adj, jnp.eye(N, dtype=jnp.float32))   # self-loops: every row has an edge

    # xavier_normal_(gain=1.414)
    w_std = 1.414 * math.sqrt(2.0 / (F_IN + F_OUT))
    a_std = 1.414 * math.sqrt(2.0 / (1 + 2 * F_OUT))
    W = w_std * jax.random.normal(kw, (F_IN, F_OUT), jnp.float32)
    a = a_std * jax.random.normal(ka, (1, 2 * F_OUT), jnp.float32)

    out = sp_graph_attention_layer(x, adj, W, a, alpha=ALPHA, concat=True,
                                   block_rows=64)
    out = jax.block_until_ready(out)

    ref = _reference(x, adj, W, a, ALPHA, concat=True)

    assert out.shape == (N, F_OUT), out.shape
    assert out.dtype == jnp.float32
    assert bool(jnp.all(jnp.isfinite(out)))
    # Tolerance accounts for the bf16 attn@h aggregation (f32 accumulation).
    assert bool(jnp.allclose(out, ref, rtol=2e-2, atol=2e-2)), \
        float(jnp.max(jnp.abs(out - ref)))
    print("KERNEL_OK")
</pallas_src>

<mosaic_0001>
module attributes {stable_mosaic.version = 11 : i64} {
  func.func @_spgat_project_kernel(%arg0: i32, %arg1: memref<256x64xf32, #tpu.memory_space<vmem>>, %arg2: memref<64x128xf32, #tpu.memory_space<vmem>>, %arg3: memref<1x128xf32, #tpu.memory_space<vmem>>, %arg4: memref<1x128xf32, #tpu.memory_space<vmem>>, %arg5: memref<256x128xbf16, #tpu.memory_space<vmem>>, %arg6: memref<256x1xf32, #tpu.memory_space<vmem>>, %arg7: memref<1x256xf32, #tpu.memory_space<vmem>>) attributes {dimension_semantics = [#tpu.dimension_semantics<arbitrary>], iteration_bounds = array<i64: 1>, scalar_prefetch = 0 : i64, scratch_operands = 0 : i64, tpu.core_type = #tpu.core_type<tc>, window_params = [{pipeline_mode = #tpu.pipeline_mode<synchronous>, transform_indices = @transform_0, window_bounds = array<i64: 256, 64>}, {pipeline_mode = #tpu.pipeline_mode<synchronous>, transform_indices = @transform_1, window_bounds = array<i64: 64, 128>}, {pipeline_mode = #tpu.pipeline_mode<synchronous>, transform_indices = @transform_2, window_bounds = array<i64: 1, 128>}, {pipeline_mode = #tpu.pipeline_mode<synchronous>, transform_indices = @transform_3, window_bounds = array<i64: 1, 128>}, {pipeline_mode = #tpu.pipeline_mode<synchronous>, transform_indices = @transform_4, window_bounds = array<i64: 256, 128>}, {pipeline_mode = #tpu.pipeline_mode<synchronous>, transform_indices = @transform_5, window_bounds = array<i64: 256, 1>}, {pipeline_mode = #tpu.pipeline_mode<synchronous>, transform_indices = @transform_6, window_bounds = array<i64: 1, 256>}]} {
    %c0 = arith.constant 0 : index
    %c0_0 = arith.constant 0 : index
    %0 = vector.load %arg1[%c0, %c0_0] : memref<256x64xf32, #tpu.memory_space<vmem>>, vector<256x64xf32>
    %c0_1 = arith.constant 0 : index
    %c0_2 = arith.constant 0 : index
    %1 = vector.load %arg2[%c0_1, %c0_2] : memref<64x128xf32, #tpu.memory_space<vmem>>, vector<64x128xf32>
    %cst = arith.constant dense<0.000000e+00> : vector<256x128xf32>
    %2 = tpu.matmul %0, %1, %cst {dimension_numbers = #tpu.dot_dimension_numbers<[1], [0], [0], [1], [0, 0, 1, 1], [], []>} : vector<256x64xf32>, vector<64x128xf32>, vector<256x128xf32> -> vector<256x128xf32>
    %3 = arith.truncf %2 : vector<256x128xf32> to vector<256x128xbf16>
    %c0_3 = arith.constant 0 : index
    %c0_4 = arith.constant 0 : index
    %4 = vector.load %arg5[%c0_3, %c0_4] : memref<256x128xbf16, #tpu.memory_space<vmem>>, vector<256x128xbf16>
    tpu.vector_store %arg5[%c0_3, %c0_4], %3 {strides = array<i32>} : memref<256x128xbf16, #tpu.memory_space<vmem>>, vector<256x128xbf16>,
    %c0_5 = arith.constant 0 : index
    %c0_6 = arith.constant 0 : index
    %5 = vector.load %arg3[%c0_5, %c0_6] : memref<1x128xf32, #tpu.memory_space<vmem>>, vector<1x128xf32>
    %cst_7 = arith.constant dense<0.000000e+00> : vector<256x1xf32>
    %6 = tpu.matmul %2, %5, %cst_7 {dimension_numbers = #tpu.dot_dimension_numbers<[1], [1], [0], [0], [0, 0, 1, 0], [], []>} : vector<256x128xf32>, vector<1x128xf32>, vector<256x1xf32> -> vector<256x1xf32>
    %c0_8 = arith.constant 0 : index
    %c0_9 = arith.constant 0 : index
    %7 = vector.load %arg6[%c0_8, %c0_9] : memref<256x1xf32, #tpu.memory_space<vmem>>, vector<256x1xf32>
    tpu.vector_store %arg6[%c0_8, %c0_9], %6 {strides = array<i32>} : memref<256x1xf32, #tpu.memory_space<vmem>>, vector<256x1xf32>,
    %c0_10 = arith.constant 0 : index
    %c0_11 = arith.constant 0 : index
    %8 = vector.load %arg4[%c0_10, %c0_11] : memref<1x128xf32, #tpu.memory_space<vmem>>, vector<1x128xf32>
    %cst_12 = arith.constant dense<0.000000e+00> : vector<1x256xf32>
    %9 = tpu.matmul %8, %2, %cst_12 {dimension_numbers = #tpu.dot_dimension_numbers<[1], [1], [0], [0], [0, 0, 1, 0], [], []>} : vector<1x128xf32>, vector<256x128xf32>, vector<1x256xf32> -> vector<1x256xf32>
    %c0_13 = arith.constant 0 : index
    %c0_14 = arith.constant 0 : index
    %10 = vector.load %arg7[%c0_13, %c0_14] : memref<1x256xf32, #tpu.memory_space<vmem>>, vector<1x256xf32>
    tpu.vector_store %arg7[%c0_13, %c0_14], %9 {strides = array<i32>} : memref<1x256xf32, #tpu.memory_space<vmem>>, vector<1x256xf32>,
    return
  }
  func.func @transform_0(%arg0: i32) -> (i32, i32) {
    %c0_i32 = arith.constant 0 : i32
    %c0_i32_0 = arith.constant 0 : i32
    %c0_i32_1 = arith.constant 0 : i32
    return %c0_i32, %c0_i32_0 : i32, i32
  }
  func.func @transform_1(%arg0: i32) -> (i32, i32) {
    %c0_i32 = arith.constant 0 : i32
    %c0_i32_0 = arith.constant 0 : i32
    %c0_i32_1 = arith.constant 0 : i32
    return %c0_i32, %c0_i32_0 : i32, i32
  }
  func.func @transform_2(%arg0: i32) -> (i32, i32) {
    %c0_i32 = arith.constant 0 : i32
    %c0_i32_0 = arith.constant 0 : i32
    %c0_i32_1 = arith.constant 0 : i32
    return %c0_i32, %c0_i32_0 : i32, i32
  }
  func.func @transform_3(%arg0: i32) -> (i32, i32) {
    %c0_i32 = arith.constant 0 : i32
    %c0_i32_0 = arith.constant 0 : i32
    %c0_i32_1 = arith.constant 0 : i32
    return %c0_i32, %c0_i32_0 : i32, i32
  }
  func.func @transform_4(%arg0: i32) -> (i32, i32) {
    %c0_i32 = arith.constant 0 : i32
    %c0_i32_0 = arith.constant 0 : i32
    %c0_i32_1 = arith.constant 0 : i32
    return %c0_i32, %c0_i32_0 : i32, i32
  }
  func.func @transform_5(%arg0: i32) -> (i32, i32) {
    %c0_i32 = arith.constant 0 : i32
    %c0_i32_0 = arith.constant 0 : i32
    %c0_i32_1 = arith.constant 0 : i32
    return %c0_i32, %c0_i32_0 : i32, i32
  }
  func.func @transform_6(%arg0: i32) -> (i32, i32) {
    %c0_i32 = arith.constant 0 : i32
    %c0_i32_0 = arith.constant 0 : i32
    %c0_i32_1 = arith.constant 0 : i32
    return %c0_i32, %c0_i32_0 : i32, i32
  }
}

</mosaic_0001>

<bundles_post_ra>
// kernel: tpu_custom_call.1
= control target key start
LH: loop header
LB: loop body
LE: loop exit
PB: predicated region body
PF: predicated region fallthrough
CT: control target
= control target key end

     0   :  { %12 = vsyncpa [#allocation3], 0  ;;  %vm62_vm0 = vcmask 523264   ;;  %s1660_s0 = inlined_call_operand.vmem [shape: f32[256,64], index: 0, kind: input, shape index: {}]   ;;  %s1661_s1 = inlined_call_operand.vmem [shape: f32[64,128], index: 1, kind: input, shape index: {}]   ;;  %s1662_s2 = inlined_call_operand.vmem [shape: f32[1,128], index: 2, kind: input, shape index: {}]   ;;  %s1663_s3 = inlined_call_operand.vmem [shape: f32[1,128], index: 3, kind: input, shape index: {}]   ;;  %s1664_s4 = inlined_call_operand.hbm [shape: bf16[256,128], index: 4, kind: output, shape index: {0}]   ;;  %s1665_s5 = inlined_call_operand.vmem [shape: f32[256,1], index: 5, kind: output, shape index: {1}]   ;;  %s1666_s6 = inlined_call_operand.hbm [shape: f32[1,256], index: 6, kind: output, shape index: {2}]  }
   0x1   :  { %v54_v0 = vld [vmem:[%s1661_s1] sm:$0xff]  ;;  %v55_v1 = vld [vmem:[%s1661_s1 + $0x8] sm:$0xff]  ;;  %v56_v2 = vld [vmem:[%s1661_s1 + $0x10] sm:$0xff] }
   0x2   :  { %v1139_v3 = vpack.c.bf16 %v55_v1, %v54_v0  ;;  %v57_v4 = vld [vmem:[%s1661_s1 + $0x18] sm:$0xff]  ;;  %v58_v6 = vld [vmem:[%s1661_s1 + $0x20] sm:$0xff]  ;;  %v59_v7 = vld [vmem:[%s1661_s1 + $0x28] sm:$0xff] }
   0x3   :  { %v1143_v5 = vpack.c.bf16 %v57_v4, %v56_v2  ;;  %v22_v8 = vld [vmem:[%s1660_s0] sm:$0xff]  ;;  %v1147_v9 = vpack.c.bf16 %v59_v7, %v58_v6  ;;  %v60_v10 = vld [vmem:[%s1661_s1 + $0x30] sm:$0xff]  ;;  %v61_v11 = vld [vmem:[%s1661_s1 + $0x38] sm:$0xff] }
   0x4   :  { %1140 = vmatprep.subr.bf16.mxu0 %v1139_v3  ;;  %1091 = vmatprep.mubr.msk.f32.mxu0 %vm62_vm0, %v22_v8  ;;  %v1151_v12 = vpack.c.bf16 %v61_v11, %v60_v10 }
   0x5   :  { %1142 = vmatpush3.bf16.msra.mxu0 %v1139_v3 }
   0x6   :  { %1144 = vmatprep.subr.bf16.mxu0 %v1143_v5 }
   0x9   :  { %1146 = vmatpush3.bf16.msra.mxu0 %v1143_v5 }
   0xa   :  { %1148 = vmatprep.subr.bf16.mxu0 %v1147_v9 }
   0xd   :  { %1150 = vmatpush3.bf16.msra.mxu0 %v1147_v9 }
   0xe   :  { %1152 = vmatprep.subr.bf16.mxu0 %v1151_v12 }
   0xf   :  { %13 = vsyncpa [#allocation5], 0  ;;  %v23_v13 = vld [vmem:[%s1660_s0 + $0x8] sm:$0xff]  ;;  %v24_v14 = vld [vmem:[%s1660_s0 + $0x10] sm:$0xff]  ;;  %vm647_vm1 = vcmask 7168   ;;  %s1240_s17 = smov [#allocation2]  }
  0x10   :  { %v25_v15 = vld [vmem:[%s1660_s0 + $0x18] sm:$0xff]  ;;  %v26_v16 = vld [vmem:[%s1660_s0 + $0x20] sm:$0xff]  ;;  %v27_v17 = vld [vmem:[%s1660_s0 + $0x28] sm:$0xff]  ;;  %s780_s18 = sshll.u32 %s1240_s17, 4  ;;  %s781_s18 = int_to_ptr.vmem [resolvable:$true] %s780_s18 }
  0x11   :  { %1154 = vmatpush3.bf16.msra.mxu0 %v1151_v12  ;;  %v28_v18 = vld [vmem:[%s1660_s0 + $0x30] sm:$0xff]  ;;  %v29_v19 = vld [vmem:[%s1660_s0 + $0x38] sm:$0xff]  ;;  %v30_v20 = vld [vmem:[%s1660_s0 + $0x40] sm:$0xff]  ;;  %s1192_s22 = scalar_lea.vmem %s781_s18, 2048  ;;  %p1197_p1 = scmp.lt.s32.totalorder %s781_s18, %s781_s18 }
  0x12   :  { %v31_v21 = vld [vmem:[%s1660_s0 + $0x48] sm:$0xff]  ;;  %v32_v22 = vld [vmem:[%s1660_s0 + $0x50] sm:$0xff]  ;;  %v33_v23 = vld [vmem:[%s1660_s0 + $0x58] sm:$0xff]  ;;  %p1193_p0 = scmp.ne.s32.totalorder %s781_s18, %s1192_s22  ;;  %p1198_p2 = scmp.lt.s32.totalorder %s1192_s22, %s1192_s22 }
  0x13   :  { %v34_v24 = vld [vmem:[%s1660_s0 + $0x60] sm:$0xff]  ;;  %v35_v25 = vld [vmem:[%s1660_s0 + $0x68] sm:$0xff]  ;;  %v36_v26 = vld [vmem:[%s1660_s0 + $0x70] sm:$0xff] }
  0x14   :  { %1092 = vmatmul.mubr.msk.f32.vlgmr.msra.gmra.mrb[0].mxu0 %vm62_vm0, %v23_v13  ;;  %v37_v27 = vld [vmem:[%s1660_s0 + $0x78] sm:$0xff]  ;;  %v38_v28 = vld [vmem:[%s1660_s0 + $0x80] sm:$0xff]  ;;  %v39_v29 = vld [vmem:[%s1660_s0 + $0x88] sm:$0xff]  ;;  %p1199_p3 = por %p1198_p2, %p1197_p1 }
  0x15   :  { %1094 = vmatprep.mubr.msk.f32.mxu0 %vm62_vm0, %v24_v14  ;;  %v40_v30 = vld [vmem:[%s1660_s0 + $0x90] sm:$0xff]  ;;  %v41_v31 = vld [vmem:[%s1660_s0 + $0x98] sm:$0xff]  ;;  %v42_v32 = vld [vmem:[%s1660_s0 + $0xa0] sm:$0xff] }
  0x16   :  { %v43_v33 = vld [vmem:[%s1660_s0 + $0xa8] sm:$0xff]  ;;  %v44_v34 = vld [vmem:[%s1660_s0 + $0xb0] sm:$0xff]  ;;  %v45_v35 = vld [vmem:[%s1660_s0 + $0xb8] sm:$0xff]  ;;  %p1200_p4 = pnand %p1199_p3, %p1193_p0 }
  0x17   :  { %v46_v36 = vld [vmem:[%s1660_s0 + $0xc0] sm:$0xff]  ;;  %v47_v37 = vld [vmem:[%s1660_s0 + $0xc8] sm:$0xff]  ;;  %v48_v38 = vld [vmem:[%s1660_s0 + $0xd0] sm:$0xff] }
  0x18   :  { %1095 = vmatmul.mubr.msk.f32.gmra.mrb[2].mxu0 %vm62_vm0, %v25_v15  ;;  %v49_v39 = vld [vmem:[%s1660_s0 + $0xd8] sm:$0xff]  ;;  %v50_v40 = vld [vmem:[%s1660_s0 + $0xe0] sm:$0xff]  ;;  %v51_v41 = vld [vmem:[%s1660_s0 + $0xe8] sm:$0xff] }
  0x19   :  { %1097 = vmatprep.mubr.msk.f32.mxu0 %vm62_vm0, %v26_v16  ;;  %v52_v42 = vld [vmem:[%s1660_s0 + $0xf0] sm:$0xff]  ;;  %v53_v43 = vld [vmem:[%s1660_s0 + $0xf8] sm:$0xff]  ;;  %v1435_v44 = vld [vmem:[%s1663_s3] sm:$0x1] }
  0x1a   :  { %1073 = vmatprep.mubr.f32.mxu1 %v1435_v44  ;;  %v1441_v45 = vld [vmem:[%s1662_s2] ss:$0 sm:$0xff] }
  0x1c   :  { %1098 = vmatmul.mubr.msk.f32.gmra.mrb[4].mxu0 %vm62_vm0, %v27_v17 }
  0x1d   :  { %1100 = vmatprep.mubr.msk.f32.mxu0 %vm62_vm0, %v28_v18 }
  0x20   :  { %1101 = vmatmul.mubr.msk.f32.gmra.mrb[6].mxu0 %vm62_vm0, %v29_v19 }
  0x21   :  { %1103 = vmatprep.mubr.msk.f32.mxu0 %vm62_vm0, %v30_v20 }
  0x24   :  { %1104 = vmatmul.mubr.msk.f32.gmra.mrb[8].mxu0 %vm62_vm0, %v31_v21 }
  0x25   :  { %1106 = vmatprep.mubr.msk.f32.mxu0 %vm62_vm0, %v32_v22 }
  0x28   :  { %1107 = vmatmul.mubr.msk.f32.gmra.mrb[10].mxu0 %vm62_vm0, %v33_v23 }
  0x29   :  { %1109 = vmatprep.mubr.msk.f32.mxu0 %vm62_vm0, %v34_v24 }
  0x2c   :  { %1110 = vmatmul.mubr.msk.f32.gmra.mrb[12].mxu0 %vm62_vm0, %v35_v25 }
  0x2d   :  { %1112 = vmatprep.mubr.msk.f32.mxu0 %vm62_vm0, %v36_v26 }
  0x30   :  { %1113 = vmatmul.mubr.msk.f32.gmra.mrb[14].mxu0 %vm62_vm0, %v37_v27 }
  0x31   :  { %1115 = vmatprep.mubr.msk.f32.mxu0 %vm62_vm0, %v38_v28 }
  0x34   :  { %1116 = vmatmul.mubr.msk.f32.gmra.mrb[16].mxu0 %vm62_vm0, %v39_v29 }
  0x35   :  { %1118 = vmatprep.mubr.msk.f32.mxu0 %vm62_vm0, %v40_v30 }
  0x38   :  { %1119 = vmatmul.mubr.msk.f32.gmra.mrb[18].mxu0 %vm62_vm0, %v41_v31 }
  0x39   :  { %1121 = vmatprep.mubr.msk.f32.mxu0 %vm62_vm0, %v42_v32 }
  0x3c   :  { %1122 = vmatmul.mubr.msk.f32.gmra.mrb[20].mxu0 %vm62_vm0, %v43_v33 }
  0x3d   :  { %1124 = vmatprep.mubr.msk.f32.mxu0 %vm62_vm0, %v44_v34 }
  0x40   :  { %1125 = vmatmul.mubr.msk.f32.gmra.mrb[22].mxu0 %vm62_vm0, %v45_v35 }
  0x41   :  { %1127 = vmatprep.mubr.msk.f32.mxu0 %vm62_vm0, %v46_v36 }
  0x44   :  { %1128 = vmatmul.mubr.msk.f32.gmra.mrb[24].mxu0 %vm62_vm0, %v47_v37 }
  0x45   :  { %1130 = vmatprep.mubr.msk.f32.mxu0 %vm62_vm0, %v48_v38 }
  0x48   :  { %1131 = vmatmul.mubr.msk.f32.gmra.mrb[26].mxu0 %vm62_vm0, %v49_v39 }
  0x49   :  { %1133 = vmatprep.mubr.msk.f32.mxu0 %vm62_vm0, %v50_v40 }
  0x4c   :  { %1134 = vmatmul.mubr.msk.f32.gmra.mrb[28].mxu0 %vm62_vm0, %v51_v41 }
  0x4d   :  { %1136 = vmatprep.mubr.msk.f32.mxu0 %vm62_vm0, %v52_v42 }
  0x50   :  { %1137 = vmatmul.mubr.msk.f32.gmra.mrb[30].mxu0 %vm62_vm0, %v53_v43 }
  0xe7   :  { %v1093_v46 = vpop.f32.mrb[0].mxu0 }
  0xe8   :  { %v225_v47 = vpop.f32.mrb[1].mxu0  ;;  %v552_v48 = vmul.f32 %v1093_v46, %v1441_v45 }
  0xe9   :  { %v1444_v49 = vpack.c.bf16 %v1093_v46, %v225_v47  ;;  %v551_v52 = vmul.f32 %v1441_v45, %v225_v47 }
  0xea   :  { %585 = vadd.xlane.f32.xlu0 %v552_v48 }
  0xeb   :  { %v1096_v50 = vpop.f32.mrb[2].mxu0  ;;  %910 = vst [vmem:[#allocation2] sm:$0xff] %v1444_v49  }
  0xec   :  { %v235_v51 = vpop.f32.mrb[3].mxu0  ;;  %v554_v53 = vmul.f32 %v1096_v50, %v1441_v45 }
  0xed   :  { %v1449_v54 = vpack.c.bf16 %v1096_v50, %v235_v51  ;;  %v553_v57 = vmul.f32 %v1441_v45, %v235_v51 }
  0xee   :  { %583 = vadd.xlane.f32.xlu0 %v551_v52  ;;  %589 = vadd.xlane.f32.xlu1 %v554_v53 }
  0xef   :  { %986 = vst [vmem:[#allocation2 + $0x8] sm:$0xff] %v1449_v54   ;;  %v1099_v55 = vpop.f32.mrb[4].mxu0 }
  0xf0   :  { %v245_v56 = vpop.f32.mrb[5].mxu0  ;;  %v556_v62 = vmul.f32 %v1099_v55, %v1441_v45 }
  0xf1   :  { %v1453_v58 = vpack.c.bf16 %v1099_v55, %v245_v56  ;;  %v555_v59 = vmul.f32 %v1441_v45, %v245_v56 }
  0xf2   :  { %587 = vadd.xlane.f32.xlu1 %v553_v57 }
  0xf3   :  { %987 = vst [vmem:[#allocation2 + $0x10] sm:$0xff] %v1453_v58   ;;  %591 = vadd.xlane.f32.xlu0 %v555_v59  ;;  %v1102_v60 = vpop.f32.mrb[6].mxu0 }
  0xf4   :  { %v255_v61 = vpop.f32.mrb[7].mxu0  ;;  %v558_v3 = vmul.f32 %v1102_v60, %v1441_v45 }
  0xf5   :  { %v1458_v63 = vpack.c.bf16 %v1102_v60, %v255_v61  ;;  %v557_v0 = vmul.f32 %v1441_v45, %v255_v61 }
  0xf6   :  { %593 = vadd.xlane.f32.xlu1 %v556_v62 }
  0xf7   :  { %988 = vst [vmem:[#allocation2 + $0x18] sm:$0xff] %v1458_v63   ;;  %595 = vadd.xlane.f32.xlu0 %v557_v0  ;;  %v1105_v1 = vpop.f32.mrb[8].mxu0 }
  0xf8   :  { %v265_v2 = vpop.f32.mrb[9].mxu0  ;;  %v560_v8 = vmul.f32 %v1105_v1, %v1441_v45 }
  0xf9   :  { %v1463_v4 = vpack.c.bf16 %v1105_v1, %v265_v2  ;;  %v559_v5 = vmul.f32 %v1441_v45, %v265_v2 }
  0xfa   :  { %597 = vadd.xlane.f32.xlu1 %v558_v3 }
  0xfb   :  { %989 = vst [vmem:[#allocation2 + $0x20] sm:$0xff] %v1463_v4   ;;  %599 = vadd.xlane.f32.xlu0 %v559_v5  ;;  %v1108_v6 = vpop.f32.mrb[10].mxu0 }
  0xfc   :  { %v275_v7 = vpop.f32.mrb[11].mxu0  ;;  %v562_v13 = vmul.f32 %v1108_v6, %v1441_v45 }
  0xfd   :  { %v1468_v9 = vpack.c.bf16 %v1108_v6, %v275_v7  ;;  %v561_v10 = vmul.f32 %v1441_v45, %v275_v7 }
  0xfe   :  { %601 = vadd.xlane.f32.xlu1 %v560_v8 }
  0xff   :  { %990 = vst [vmem:[#allocation2 + $0x28] sm:$0xff] %v1468_v9   ;;  %603 = vadd.xlane.f32.xlu0 %v561_v10  ;;  %v1111_v11 = vpop.f32.mrb[12].mxu0 }
 0x100   :  { %v285_v12 = vpop.f32.mrb[13].mxu0  ;;  %v564_v18 = vmul.f32 %v1111_v11, %v1441_v45 }
 0x101   :  { %v1473_v14 = vpack.c.bf16 %v1111_v11, %v285_v12  ;;  %v563_v15 = vmul.f32 %v1441_v45, %v285_v12 }
 0x102   :  { %605 = vadd.xlane.f32.xlu1 %v562_v13 }
 0x103   :  { %991 = vst [vmem:[#allocation2 + $0x30] sm:$0xff] %v1473_v14   ;;  %607 = vadd.xlane.f32.xlu0 %v563_v15  ;;  %v1114_v16 = vpop.f32.mrb[14].mxu0 }
 0x104   :  { %v295_v17 = vpop.f32.mrb[15].mxu0  ;;  %v566_v23 = vmul.f32 %v1114_v16, %v1441_v45 }
 0x105   :  { %v1478_v19 = vpack.c.bf16 %v1114_v16, %v295_v17  ;;  %v565_v20 = vmul.f32 %v1441_v45, %v295_v17 }
 0x106   :  { %609 = vadd.xlane.f32.xlu1 %v564_v18 }
 0x107   :  { %992 = vst [vmem:[#allocation2 + $0x38] sm:$0xff] %v1478_v19   ;;  %611 = vadd.xlane.f32.xlu0 %v565_v20  ;;  %v1117_v21 = vpop.f32.mrb[16].mxu0 }
 0x108   :  { %v305_v22 = vpop.f32.mrb[17].mxu0  ;;  %v568_v27 = vmul.f32 %v1117_v21, %v1441_v45 }
 0x109   :  { %v567_v24 = vmul.f32 %v1441_v45, %v305_v22  ;;  %v949_v25 = vpack.c.bf16 %v1117_v21, %v305_v22 }
 0x10a   :  { %613 = vadd.xlane.f32.xlu1 %v566_v23 }
 0x10b   :  { %615 = vadd.xlane.f32.xlu0 %v567_v24  ;;  %993 = vst [vmem:[#allocation2 + $0x40] sm:$0xff] %v949_v25   ;;  %1156 = vmatprep.subr.bf16.mxu1 %v949_v25  ;;  %v1120_v26 = vpop.f32.mrb[18].mxu0 }
 0x10c   :  { %1158 = vmatpush3.bf16.xpose.msra.mxu1 %v1444_v49  ;;  %v315_v28 = vpop.f32.mrb[19].mxu0  ;;  %v570_v31 = vmul.f32 %v1120_v26, %v1441_v45 }
 0x10d   :  { %v954_v29 = vpack.c.bf16 %v1120_v26, %v315_v28  ;;  %v569_v30 = vmul.f32 %v1441_v45, %v315_v28 }
 0x10e   :  { %617 = vadd.xlane.f32.xlu1 %v568_v27 }
 0x10f   :  { %994 = vst [vmem:[#allocation2 + $0x48] sm:$0xff] %v954_v29   ;;  %619 = vadd.xlane.f32.xlu0 %v569_v30  ;;  %1160 = vmatprep.subr.bf16.mxu1 %v954_v29  ;;  %v1123_v32 = vpop.f32.mrb[20].mxu0 }
 0x110   :  { %v325_v33 = vpop.f32.mrb[21].mxu0  ;;  %v572_v36 = vmul.f32 %v1123_v32, %v1441_v45 }
 0x111   :  { %v959_v34 = vpack.c.bf16 %v1123_v32, %v325_v33  ;;  %v571_v35 = vmul.f32 %v1441_v45, %v325_v33 }
 0x112   :  { %621 = vadd.xlane.f32.xlu1 %v570_v31 }
 0x113   :  { %995 = vst [vmem:[#allocation2 + $0x50] sm:$0xff] %v959_v34   ;;  %623 = vadd.xlane.f32.xlu0 %v571_v35  ;;  %v1126_v37 = vpop.f32.mrb[22].mxu0 }
 0x114   :  { %1162 = vmatpush3.bf16.xpose.msra.mxu1 %v1449_v54  ;;  %v335_v38 = vpop.f32.mrb[23].mxu0  ;;  %v574_v41 = vmul.f32 %v1126_v37, %v1441_v45 }
 0x115   :  { %1164 = vmatprep.subr.bf16.mxu1 %v959_v34  ;;  %v964_v39 = vpack.c.bf16 %v1126_v37, %v335_v38  ;;  %v573_v40 = vmul.f32 %v1441_v45, %v335_v38 }
 0x116   :  { %625 = vadd.xlane.f32.xlu1 %v572_v36 }
 0x117   :  { %996 = vst [vmem:[#allocation2 + $0x58] sm:$0xff] %v964_v39   ;;  %627 = vadd.xlane.f32.xlu0 %v573_v40  ;;  %v1129_v42 = vpop.f32.mrb[24].mxu0 }
 0x118   :  { %v345_v43 = vpop.f32.mrb[25].mxu0  ;;  %v576_v48 = vmul.f32 %v1129_v42, %v1441_v45 }
 0x119   :  { %v969_v46 = vpack.c.bf16 %v1129_v42, %v345_v43  ;;  %v575_v47 = vmul.f32 %v1441_v45, %v345_v43 }
 0x11a   :  { %629 = vadd.xlane.f32.xlu1 %v574_v41 }
 0x11b   :  { %997 = vst [vmem:[#allocation2 + $0x60] sm:$0xff] %v969_v46   ;;  %631 = vadd.xlane.f32.xlu0 %v575_v47  ;;  %v1132_v49 = vpop.f32.mrb[26].mxu0 }
 0x11c   :  { %1166 = vmatpush3.bf16.xpose.msra.mxu1 %v1453_v58  ;;  %v355_v50 = vpop.f32.mrb[27].mxu0  ;;  %v578_v53 = vmul.f32 %v1132_v49, %v1441_v45 }
 0x11d   :  { %1168 = vmatprep.subr.bf16.mxu1 %v964_v39  ;;  %v974_v51 = vpack.c.bf16 %v1132_v49, %v355_v50  ;;  %v577_v52 = vmul.f32 %v1441_v45, %v355_v50 }
 0x11e   :  { %633 = vadd.xlane.f32.xlu1 %v576_v48 }
 0x11f   :  { %998 = vst [vmem:[#allocation2 + $0x68] sm:$0xff] %v974_v51   ;;  %635 = vadd.xlane.f32.xlu0 %v577_v52  ;;  %v1135_v54 = vpop.f32.mrb[28].mxu0 }
 0x120   :  { %v365_v55 = vpop.f32.mrb[29].mxu0  ;;  %v580_v59 = vmul.f32 %v1135_v54, %v1441_v45 }
 0x121   :  { %v979_v56 = vpack.c.bf16 %v1135_v54, %v365_v55  ;;  %v579_v57 = vmul.f32 %v1441_v45, %v365_v55 }
 0x122   :  { %637 = vadd.xlane.f32.xlu1 %v578_v53 }
 0x123   :  { %999 = vst [vmem:[#allocation2 + $0x70] sm:$0xff] %v979_v56   ;;  %639 = vadd.xlane.f32.xlu0 %v579_v57  ;;  %v1138_v58 = vpop.f32.mrb[30].mxu0 }
 0x124   :  { %1170 = vmatpush3.bf16.xpose.msra.mxu1 %v1458_v63  ;;  %v375_v60 = vpop.f32.mrb[31].mxu0  ;;  %v582_v61 = vmul.f32 %v1138_v58, %v1441_v45 }
 0x125   :  { %1172 = vmatprep.subr.bf16.mxu1 %v969_v46  ;;  %v984_v62 = vpack.c.bf16 %v1138_v58, %v375_v60  ;;  %v581_v0 = vmul.f32 %v1441_v45, %v375_v60 }
 0x126   :  { %641 = vadd.xlane.f32.xlu1 %v580_v59 }
 0x127   :  { %1000 = vst [vmem:[#allocation2 + $0x78] sm:$0xff] %v984_v62   ;;  %643 = vadd.xlane.f32.xlu0 %v581_v0 }
 0x12a   :  { %645 = vadd.xlane.f32.xlu1 %v582_v61 }
 0x12c   :  { %1174 = vmatpush3.bf16.xpose.msra.mxu1 %v1463_v4 }
 0x12d   :  { %1176 = vmatprep.subr.bf16.mxu1 %v974_v51 }
 0x134   :  { %1178 = vmatpush3.bf16.xpose.msra.mxu1 %v1468_v9 }
 0x135   :  { %1180 = vmatprep.subr.bf16.mxu1 %v979_v56 }
 0x13c   :  { %1182 = vmatpush3.bf16.xpose.msra.mxu1 %v1473_v14 }
 0x13d   :  { %1184 = vmatprep.subr.bf16.mxu1 %v984_v62 }
 0x144   :  { %1186 = vmatpush3.bf16.xpose.msra.mxu1 %v1478_v19 }
 0x14b   :  { %1074 = vmatmul.mubr.f32.vlgmr.msra.gmra.mrb[0].mxu1 %v1435_v44 }
 0x177   :  { %v586_v63 = vpop.xlane.xlu0 %585 }
 0x178   :  { %649 = vst.msk [vmem:[%s1665_s5 + $0x8] sm:$0xff] %vm647_vm1, %v586_v63 }
 0x17b   :  { %v584_v45 = vpop.xlane.xlu0 %583  ;;  %v590_v1 = vpop.xlane.xlu1 %589 }
 0x17c   :  { %648 = vst.msk [vmem:[%s1665_s5] sm:$0xff] %vm647_vm1, %v584_v45  ;;  %651 = vst.msk [vmem:[%s1665_s5 + $0x18] sm:$0xff] %vm647_vm1, %v590_v1 }
 0x17f   :  { %v588_v44 = vpop.xlane.xlu1 %587 }
 0x180   :  { %650 = vst.msk [vmem:[%s1665_s5 + $0x10] sm:$0xff] %vm647_vm1, %v588_v44  ;;  %v592_v2 = vpop.xlane.xlu0 %591 }
 0x181   :  { %652 = vst.msk [vmem:[%s1665_s5 + $0x20] sm:$0xff] %vm647_vm1, %v592_v2 }
 0x183   :  { %v594_v3 = vpop.xlane.xlu1 %593 }
 0x184   :  { %653 = vst.msk [vmem:[%s1665_s5 + $0x28] sm:$0xff] %vm647_vm1, %v594_v3  ;;  %v596_v4 = vpop.xlane.xlu0 %595 }
 0x185   :  { %654 = vst.msk [vmem:[%s1665_s5 + $0x30] sm:$0xff] %vm647_vm1, %v596_v4 }
 0x187   :  { %v598_v5 = vpop.xlane.xlu1 %597 }
 0x188   :  { %655 = vst.msk [vmem:[%s1665_s5 + $0x38] sm:$0xff] %vm647_vm1, %v598_v5  ;;  %v600_v6 = vpop.xlane.xlu0 %599 }
 0x189   :  { %656 = vst.msk [vmem:[%s1665_s5 + $0x40] sm:$0xff] %vm647_vm1, %v600_v6 }
 0x18b   :  { %v602_v7 = vpop.xlane.xlu1 %601 }
 0x18c   :  { %657 = vst.msk [vmem:[%s1665_s5 + $0x48] sm:$0xff] %vm647_vm1, %v602_v7  ;;  %v604_v8 = vpop.xlane.xlu0 %603 }
 0x18d   :  { %658 = vst.msk [vmem:[%s1665_s5 + $0x50] sm:$0xff] %vm647_vm1, %v604_v8 }
 0x18f   :  { %v606_v9 = vpop.xlane.xlu1 %605 }
 0x190   :  { %659 = vst.msk [vmem:[%s1665_s5 + $0x58] sm:$0xff] %vm647_vm1, %v606_v9  ;;  %v608_v10 = vpop.xlane.xlu0 %607 }
 0x191   :  { %660 = vst.msk [vmem:[%s1665_s5 + $0x60] sm:$0xff] %vm647_vm1, %v608_v10 }
 0x193   :  { %v610_v11 = vpop.xlane.xlu1 %609 }
 0x194   :  { %661 = vst.msk [vmem:[%s1665_s5 + $0x68] sm:$0xff] %vm647_vm1, %v610_v11  ;;  %v612_v12 = vpop.xlane.xlu0 %611 }
 0x195   :  { %662 = vst.msk [vmem:[%s1665_s5 + $0x70] sm:$0xff] %vm647_vm1, %v612_v12 }
 0x197   :  { %v614_v13 = vpop.xlane.xlu1 %613 }
 0x198   :  { %663 = vst.msk [vmem:[%s1665_s5 + $0x78] sm:$0xff] %vm647_vm1, %v614_v13  ;;  %v616_v14 = vpop.xlane.xlu0 %615 }
 0x199   :  { %664 = vst.msk [vmem:[%s1665_s5 + $0x80] sm:$0xff] %vm647_vm1, %v616_v14 }
 0x19b   :  { %v618_v15 = vpop.xlane.xlu1 %617 }
 0x19c   :  { %665 = vst.msk [vmem:[%s1665_s5 + $0x88] sm:$0xff] %vm647_vm1, %v618_v15  ;;  %v620_v16 = vpop.xlane.xlu0 %619 }
 0x19d   :  { %666 = vst.msk [vmem:[%s1665_s5 + $0x90] sm:$0xff] %vm647_vm1, %v620_v16 }
 0x19f   :  { %v622_v17 = vpop.xlane.xlu1 %621 }
 0x1a0   :  { %667 = vst.msk [vmem:[%s1665_s5 + $0x98] sm:$0xff] %vm647_vm1, %v622_v17  ;;  %v624_v18 = vpop.xlane.xlu0 %623 }
 0x1a1   :  { %668 = vst.msk [vmem:[%s1665_s5 + $0xa0] sm:$0xff] %vm647_vm1, %v624_v18 }
 0x1a3   :  { %v626_v19 = vpop.xlane.xlu1 %625 }
 0x1a4   :  { %669 = vst.msk [vmem:[%s1665_s5 + $0xa8] sm:$0xff] %vm647_vm1, %v626_v19  ;;  %v628_v20 = vpop.xlane.xlu0 %627 }
 0x1a5   :  { %670 = vst.msk [vmem:[%s1665_s5 + $0xb0] sm:$0xff] %vm647_vm1, %v628_v20 }
 0x1a6   :  { %1203 = shalt.err (!%p1200_p4)
}
 0x1a7   :  { %s1204_s25 = scalar_lea.hbm %s1664_s4, 2048 }
 0x1a8   :  { %p1205_p5 = scmp.ne.s32.totalorder %s1664_s4, %s1204_s25  ;;  %p1208_p6 = scmp.lt.u32.totalorder %s1204_s25, %s1664_s4 }
 0x1aa   :  { %p1210_p7 = pnand %p1208_p6, %p1205_p5 }
 0x1ac   :  { %1213 = shalt.err (!%p1210_p7)
}
 0x1ad   :  { %s1241_s0 = smov 64   ;;  %s1242_s2 = smov 4   ;;  %v630_v21 = vpop.xlane.xlu1 %629  ;;  %v632_v22 = vpop.xlane.xlu0 %631  ;;  %v1243_v30 = vmov 1966171168   ;;  %v758_v32 = vlaneseq }
 0x1ae   :  { %786 = dma.vmem_to_hbm [thread:$0]  %s781_s18, 2048, %s1664_s4, [#allocation3], %s1241_s0, %s1241_s0, %s1242_s2   ;;  %v756_v31 = vunpack.c.l.s4 %v1243_v30 }
 0x1af   :  { %671 = vst.msk [vmem:[%s1665_s5 + $0xb8] sm:$0xff] %vm647_vm1, %v630_v21  ;;  %672 = vst.msk [vmem:[%s1665_s5 + $0xc0] sm:$0xff] %vm647_vm1, %v632_v22  ;;  %v759_v34 = vshrl.u32 %v758_v32, 7  ;;  %s1244_s23 = smov [#allocation4]   ;;  %vm772_vm2 = vcmp.lt.s32.totalorder %v758_v32, 256 }
 0x1b0   :  { %v757_v33 = vunpack.c.0.s8 %v756_v31  ;;  %s795_s24 = sshll.u32 %s1244_s23, 4  ;;  %s796_s24 = int_to_ptr.vmem [resolvable:$true] %s795_s24 }
 0x1b1   :  { %v634_v23 = vpop.xlane.xlu1 %633  ;;  %v636_v24 = vpop.xlane.xlu0 %635  ;;  %s1214_s25 = scalar_lea.vmem %s796_s24, 32  ;;  %p1219_p9 = scmp.lt.s32.totalorder %s796_s24, %s796_s24 }
 0x1b2   :  { %673 = vst.msk [vmem:[%s1665_s5 + $0xc8] sm:$0xff] %vm647_vm1, %v634_v23  ;;  %674 = vst.msk [vmem:[%s1665_s5 + $0xd0] sm:$0xff] %vm647_vm1, %v636_v24  ;;  %v760_v36 = vsub.s32 %v757_v33, %v759_v34  ;;  %p1215_p8 = scmp.ne.s32.totalorder %s796_s24, %s1214_s25  ;;  %p1220_p10 = scmp.lt.s32.totalorder %s1214_s25, %s1214_s25 }
 0x1b4   :  { %p1221_p11 = por %p1220_p10, %p1219_p9 }
 0x1b5   :  { %v638_v25 = vpop.xlane.xlu1 %637  ;;  %v640_v26 = vpop.xlane.xlu0 %639 }
 0x1b6   :  { %675 = vst.msk [vmem:[%s1665_s5 + $0xd8] sm:$0xff] %vm647_vm1, %v638_v25  ;;  %676 = vst.msk [vmem:[%s1665_s5 + $0xe0] sm:$0xff] %vm647_vm1, %v640_v26  ;;  %p1222_p12 = pnand %p1221_p11, %p1215_p8 }
 0x1b9   :  { %v642_v27 = vpop.xlane.xlu1 %641  ;;  %v644_v28 = vpop.xlane.xlu0 %643 }
 0x1ba   :  { %677 = vst.msk [vmem:[%s1665_s5 + $0xe8] sm:$0xff] %vm647_vm1, %v642_v27  ;;  %678 = vst.msk [vmem:[%s1665_s5 + $0xf0] sm:$0xff] %vm647_vm1, %v644_v28 }
 0x1bd   :  { %v646_v29 = vpop.xlane.xlu1 %645 }
 0x1be   :  { %679 = vst.msk [vmem:[%s1665_s5 + $0xf8] sm:$0xff] %vm647_vm1, %v646_v29 }
 0x21e   :  { %v747_v35 = vpop.f32.mrb[0].mxu1 }
 0x21f   :  { %v749_v37 = vpop.f32.mrb[1].mxu1 }
 0x220   :  { %v754_v38 = vcombine.low %v747_v35, %v749_v37 }
 0x222   :  { %v761_v39 = vrot.slane %v754_v38, %v760_v36 }
 0x224   :  { %v768_v40 = vrot.slane %v761_v39, %v760_v36 }
 0x226   :  { %774 = vst.msk [vmem:[#allocation4] sm:$0x3] %vm772_vm2, %v768_v40 }
 0x227   :  { %1225 = shalt.err (!%p1222_p12)
}
 0x228   :  { %s1226_s27 = scalar_lea.hbm %s1666_s6, 32 }
 0x229   :  { %p1227_p13 = scmp.ne.s32.totalorder %s1666_s6, %s1226_s27  ;;  %p1230_p0 = scmp.lt.u32.totalorder %s1226_s27, %s1666_s6 }
 0x22b   :  { %p1232_p1 = pnand %p1230_p0, %p1227_p13 }
 0x22d   :  { %1235 = shalt.err (!%p1232_p1)
}
 0x22e   :  { %798 = dma.vmem_to_hbm [thread:$0]  %s796_s24, 32, %s1666_s6, [#allocation5]  }
 0x22f   :  { %1236 = dma.done.wait [#allocation3], 2048  }
 0x230   :  { %1237 = vsyncadd [#allocation3], 4294965248 }
 0x231   :  { %1238 = dma.done.wait [#allocation5], 32  }
 0x232   :  { %1239 = vsyncadd [#allocation5], 4294967264 }
 0x233   :  { %807 = vsyncpa [#allocation3], 1 }
 0x234   :  { %808 = vsyncpa [#allocation5], 1 }

</bundles_post_ra>
